<compile_context>
chip_gen: v7x
topology: tpu7x:2x2x1
jax: 0.10.0
libtpu: 0.0.40
codegen_flags: <defaults>
</compile_context>

<pallas_src>
import functools
import math

import jax
import jax.numpy as jnp
from jax import lax
from jax.experimental import pallas as pl
from jax.experimental.pallas import tpu as pltpu

_BN_EPS = 1e-5
_BN_SCALE = float(1.0 / (1.0 + _BN_EPS) ** 0.5)  # BatchNorm2d(eval, default stats)


# ---------------------------------------------------------------------------
# Fused stage kernel: bilinear-2x upsample (+1x1 projection) followed by `depth`
# conv3x3 / BN(eval) / ReLU blocks.  Whole batch folded into M; VMEM resident.
# ---------------------------------------------------------------------------
def _make_stage_kernel(depth, rows_per_sample_out):
    def kernel(*refs):
        x_ref, rowmat_ref, upmat_ref, upbias_ref = refs[:4]
        conv_refs = refs[4:4 + 4 * depth]
        o_ref = refs[-1]

        xb = x_ref[...].astype(jnp.bfloat16)                     # (B*H, W*Cin) slab
        # 2x bilinear row upsample (+ per-sample block structure) as one bf16 matmul.
        u = jnp.dot(rowmat_ref[...], xb, preferred_element_type=jnp.float32)
        # Column bilinear upsample fused with the 1x1 channel projection.
        u = jnp.dot(u.astype(jnp.bfloat16), upmat_ref[...],
                    preferred_element_type=jnp.float32)          # (B*2H, 2W*Cout) f32
        u = u + upbias_ref[...]

        rows_out = u.shape[0]
        local = lax.broadcasted_iota(jnp.int32, (rows_out, 1), 0) % rows_per_sample_out
        top_ok = local != 0                                      # row i-1 valid
        bot_ok = local != rows_per_sample_out - 1                # row i+1 valid

        for d in range(depth):
            b0, b1, b2, bias = conv_refs[4 * d:4 * d + 4]
            ub = u.astype(jnp.bfloat16)
            # +/-1 row taps via circular roll (XLU) + zeroing of rows crossing sample edges.
            u_m1 = jnp.where(top_ok, pltpu.roll(u, shift=1, axis=0),
                             0.0).astype(jnp.bfloat16)
            u_p1 = jnp.where(bot_ok, pltpu.roll(u, shift=rows_out - 1, axis=0),
                             0.0).astype(jnp.bfloat16)
            acc = jnp.dot(u_m1, b0[...], preferred_element_type=jnp.float32)
            acc = acc + jnp.dot(ub, b1[...], preferred_element_type=jnp.float32)
            acc = acc + jnp.dot(u_p1, b2[...], preferred_element_type=jnp.float32)
            u = jnp.maximum(acc + bias[...], 0.0)                # bias & BN folded, f32

        o_ref[...] = u.astype(o_ref.dtype)

    return kernel


def _stage_call(y_slab, wts, meta):
    args = [y_slab, wts["rowmat"], wts["upmat"], wts["upbias"]]
    for band in wts["convs"]:
        args += list(band)

    rows_out, n_out = meta["rows_out"], meta["n_out"]
    needed = sum(int(a.size) * a.dtype.itemsize for a in args)
    needed += rows_out * n_out * 4 * 8                    # output + in-kernel f32 temps
    vmem_limit = int(min(64 << 20, max(3 * needed, 32 << 20)))

    return pl.pallas_call(
        _make_stage_kernel(meta["depth"], meta["rows_out_per_sample"]),
        out_shape=jax.ShapeDtypeStruct((rows_out, n_out), meta["out_dtype"]),
        compiler_params=pltpu.CompilerParams(vmem_limit_bytes=vmem_limit),
    )(*args)


# ---------------------------------------------------------------------------
# Host-side (hoisted out of jit) construction of the fused matrices.
# ---------------------------------------------------------------------------
def _bilinear_1d_matrix(n):
    """(n, 2n): 2x bilinear, align_corners=False, edge clamped."""
    m = jnp.zeros((n, 2 * n), jnp.float32)
    src = jnp.arange(n)
    m = m.at[src, 2 * src].add(0.75)
    m = m.at[jnp.maximum(src - 1, 0), 2 * src].add(0.25)
    m = m.at[src, 2 * src + 1].add(0.75)
    m = m.at[jnp.minimum(src + 1, n - 1), 2 * src + 1].add(0.25)
    return m


def _conv_band_matrices(w, w2):
    """(3,3,Cin,Cout) conv weights -> 3 banded (w2*Cin, w2*Cout) matrices (one per dy),
    with the BatchNorm(eval) scale folded in; zero W-padding is implicit in the band."""
    _, _, c_in, c_out = w.shape
    bands = []
    for dy in range(3):
        band = jnp.zeros((w2, c_in, w2, c_out), jnp.float32)
        for dx in range(3):
            s = jnp.eye(w2, k=1 - dx, dtype=jnp.float32)   # w_in == w_out + dx - 1
            band = band + jnp.einsum("ab,io->aibo", s, w[dy, dx])
        bands.append((band * _BN_SCALE).reshape(w2 * c_in, w2 * c_out))
    return bands


def _pad_axis(a, axis, new_size):
    pad = new_size - a.shape[axis]
    if pad == 0:
        return a
    widths = [(0, 0)] * a.ndim
    widths[axis] = (0, pad)
    return jnp.pad(a, widths)


def _padded_channels(c, w2):
    """Smallest c' >= c with (w2*c') % 128 == 0 (lane-dense slabs), with a blow-up cap."""
    m = 128 // math.gcd(w2, 128)
    c_p = -(-c // m) * m
    if c_p > max(2 * c, c + 8):
        return c
    return c_p


def prepare_decoder(params, batch, height, width):
    """Builds per-stage fused bf16 matrices once (outside jit)."""
    metas, weights = [], []
    h, w = height, width
    c_in_p = None
    c_out_final = None
    for idx, raw in enumerate(params):
        up_w, up_b = raw["up_w"], raw["up_b"]
        c_in, c_out = up_w.shape
        if c_in_p is None:
            c_in_p = c_in
        w2, h2 = 2 * w, 2 * h
        c_out_p = _padded_channels(c_out, w2)
        n_out = w2 * c_out_p

        up_w_p = _pad_axis(_pad_axis(up_w, 0, c_in_p), 1, c_out_p)
        up_b_p = _pad_axis(up_b, 0, c_out_p)

        rowmat = jnp.kron(jnp.eye(batch, dtype=jnp.float32),
                          _bilinear_1d_matrix(h).T)             # (B*2H, B*H) block diag
        colmat = _bilinear_1d_matrix(w)                          # (W, 2W)
        upmat = jnp.einsum("wj,io->wijo", colmat, up_w_p).reshape(w * c_in_p, n_out)
        upbias = jnp.tile(up_b_p, w2)[None, :]

        convs = []
        for cw, cb in raw["blocks"]:
            cw_p = _pad_axis(_pad_axis(cw, 2, c_out_p), 3, c_out_p)
            cb_p = _pad_axis(cb, 0, c_out_p)
            b0, b1, b2 = _conv_band_matrices(cw_p, w2)
            bias = jnp.tile(cb_p * _BN_SCALE, w2)[None, :]
            convs.append((b0.astype(jnp.bfloat16), b1.astype(jnp.bfloat16),
                          b2.astype(jnp.bfloat16), bias))

        last = idx == len(params) - 1
        metas.append(dict(depth=len(convs), rows_out=batch * h2,
                          rows_out_per_sample=h2, n_out=n_out,
                          out_dtype=jnp.float32 if last else jnp.bfloat16))
        weights.append(dict(rowmat=rowmat.astype(jnp.bfloat16),
                            upmat=upmat.astype(jnp.bfloat16),
                            upbias=upbias, convs=convs))
        h, w, c_in_p = h2, w2, c_out_p
        c_out_final = c_out

    final = dict(height=h, width=w, c_pad=c_in_p, c_out=c_out_final)
    return tuple(metas), weights, final


# ---------------------------------------------------------------------------
# Decoder forward (no skip connections; upsampling_factors = 2).
# ---------------------------------------------------------------------------
def _decoder_forward_impl(x_nchw, weights, *, metas, final):
    b, c, h, w = x_nchw.shape
    # NCHW -> NHWC -> lane-dense (B*H, W*C) slab (batch folded into M).
    y = jnp.transpose(x_nchw, (0, 2, 3, 1)).reshape(b * h, w * c)
    for meta, wts in zip(metas, weights):
        y = _stage_call(y, wts, meta)
    y = y.reshape(b, final["height"], final["width"], final["c_pad"])[..., :final["c_out"]]
    return jnp.transpose(y, (0, 3, 1, 2))                         # NHWC -> NCHW


def build_decoder_forward(params, batch, height, width):
    metas, weights, final = prepare_decoder(params, batch, height, width)
    fwd = jax.jit(functools.partial(_decoder_forward_impl, metas=metas, final=final))
    return fwd, weights


def init_decoder_params(key, channels, stage_depths):
    assert len(channels) == len(stage_depths) + 1
    params = []
    in_ch = channels[0]
    for depth, out_ch in zip(stage_depths, channels[1:]):
        key, k_up = jax.random.split(key)
        if in_ch == out_ch:
            up_w = jnp.eye(out_ch, dtype=jnp.float32)   # Bilinear factory: no conv if equal
            up_b = jnp.zeros((out_ch,), jnp.float32)
        else:
            up_w = jax.random.normal(k_up, (in_ch, out_ch), jnp.float32) / jnp.sqrt(float(in_ch))
            up_b = jnp.zeros((out_ch,), jnp.float32)
        blocks = []
        blk_in = out_ch                                  # no skips -> combined == out_channels
        for _ in range(depth):
            key, kw, kb = jax.random.split(key, 3)
            w = jax.random.normal(kw, (3, 3, blk_in, out_ch), jnp.float32) / jnp.sqrt(9.0 * blk_in)
            bb = 0.01 * jax.random.normal(kb, (out_ch,), jnp.float32)
            blocks.append((w, bb))
            blk_in = out_ch
        params.append({"up_w": up_w, "up_b": up_b, "blocks": blocks})
        in_ch = out_ch
    return params


# ---------------------------------------------------------------------------
# Pure-JAX reference (same semantics) for a correctness self-check.
# ---------------------------------------------------------------------------
def _bilinear_up2_ref(y):
    B, H, W, C = y.shape
    ym = jnp.concatenate([y[:, :1], y[:, :-1]], axis=1)
    yp = jnp.concatenate([y[:, 1:], y[:, -1:]], axis=1)
    r_even = 0.75 * y + 0.25 * ym
    r_odd = 0.75 * y + 0.25 * yp
    rows = jnp.stack([r_even, r_odd], axis=2).reshape(B, 2 * H, W, C)
    cm = jnp.concatenate([rows[:, :, :1], rows[:, :, :-1]], axis=2)
    cp = jnp.concatenate([rows[:, :, 1:], rows[:, :, -1:]], axis=2)
    c_even = 0.75 * rows + 0.25 * cm
    c_odd = 0.75 * rows + 0.25 * cp
    return jnp.stack([c_even, c_odd], axis=3).reshape(B, 2 * H, 2 * W, C)


def _reference_forward(x_nchw, params):
    y = jnp.transpose(x_nchw, (0, 2, 3, 1))
    for raw in params:
        y = jnp.einsum("bhwc,cd->bhwd", y, raw["up_w"],
                       precision=lax.Precision.HIGHEST) + raw["up_b"]
        y = _bilinear_up2_ref(y)
        for w, b in raw["blocks"]:
            y = lax.conv_general_dilated(
                y, w, window_strides=(1, 1), padding="SAME",
                dimension_numbers=("NHWC", "HWIO", "NHWC"),
                precision=lax.Precision.HIGHEST)
            y = jnp.maximum((y + b) * _BN_SCALE, 0.0)
    return jnp.transpose(y, (0, 3, 1, 2))


if __name__ == "__main__":
    B, H, W = 2, 8, 8
    channels = [8, 6, 4]          # channels[0] before first stage, then one per stage
    stage_depths = [1, 2]         # upsampling_factors default = [2, 2]

    key = jax.random.PRNGKey(0)
    k_x, k_p = jax.random.split(key)
    x = jax.random.normal(k_x, (B, channels[0], H, W), dtype=jnp.float32)
    params = init_decoder_params(k_p, channels, stage_depths)

    fwd, weights = build_decoder_forward(params, B, H, W)
    y = jax.block_until_ready(fwd(x, weights))

    expected = (B, channels[-1], H * 4, W * 4)            # two 2x stages
    assert y.shape == expected, (y.shape, expected)
    assert bool(jnp.all(jnp.isfinite(y)))

    y_ref = jax.block_until_ready(_reference_forward(x, params))
    max_err = float(jnp.max(jnp.abs(y - y_ref)))
    scale = float(jnp.max(jnp.abs(y_ref)))
    assert max_err <= 5e-2 * max(1.0, scale), (max_err, scale)

    print("KERNEL_OK")
</pallas_src>

<mosaic_0001>
module attributes {stable_mosaic.version = 11 : i64} {
  func.func @kernel(%arg0: memref<32x128xbf16, #tpu.memory_space<vmem>>, %arg1: memref<64x32xbf16, #tpu.memory_space<vmem>>, %arg2: memref<128x128xbf16, #tpu.memory_space<vmem>>, %arg3: memref<1x128xf32, #tpu.memory_space<vmem>>, %arg4: memref<128x128xbf16, #tpu.memory_space<vmem>>, %arg5: memref<128x128xbf16, #tpu.memory_space<vmem>>, %arg6: memref<128x128xbf16, #tpu.memory_space<vmem>>, %arg7: memref<1x128xf32, #tpu.memory_space<vmem>>, %arg8: memref<128x128xbf16, #tpu.memory_space<vmem>>, %arg9: memref<128x128xbf16, #tpu.memory_space<vmem>>, %arg10: memref<128x128xbf16, #tpu.memory_space<vmem>>, %arg11: memref<1x128xf32, #tpu.memory_space<vmem>>, %arg12: memref<64x128xf32, #tpu.memory_space<vmem>>) attributes {dimension_semantics = [], scalar_prefetch = 0 : i64, scratch_operands = 0 : i64, tpu.core_type = #tpu.core_type<tc>} {
    %c0 = arith.constant 0 : index
    %c0_0 = arith.constant 0 : index
    %0 = vector.load %arg0[%c0, %c0_0] : memref<32x128xbf16, #tpu.memory_space<vmem>>, vector<32x128xbf16>
    %c0_1 = arith.constant 0 : index
    %c0_2 = arith.constant 0 : index
    %1 = vector.load %arg1[%c0_1, %c0_2] : memref<64x32xbf16, #tpu.memory_space<vmem>>, vector<64x32xbf16>
    %cst = arith.constant dense<0.000000e+00> : vector<64x128xf32>
    %2 = tpu.matmul %1, %0, %cst {dimension_numbers = #tpu.dot_dimension_numbers<[1], [0], [0], [1], [0, 0, 1, 1], [], []>} : vector<64x32xbf16>, vector<32x128xbf16>, vector<64x128xf32> -> vector<64x128xf32>
    %3 = arith.truncf %2 : vector<64x128xf32> to vector<64x128xbf16>
    %c0_3 = arith.constant 0 : index
    %c0_4 = arith.constant 0 : index
    %4 = vector.load %arg2[%c0_3, %c0_4] : memref<128x128xbf16, #tpu.memory_space<vmem>>, vector<128x128xbf16>
    %cst_5 = arith.constant dense<0.000000e+00> : vector<64x128xf32>
    %5 = tpu.matmul %3, %4, %cst_5 {dimension_numbers = #tpu.dot_dimension_numbers<[1], [0], [0], [1], [0, 0, 1, 1], [], []>} : vector<64x128xbf16>, vector<128x128xbf16>, vector<64x128xf32> -> vector<64x128xf32>
    %c0_6 = arith.constant 0 : index
    %c0_7 = arith.constant 0 : index
    %6 = vector.load %arg3[%c0_6, %c0_7] : memref<1x128xf32, #tpu.memory_space<vmem>>, vector<1x128xf32>
    %7 = vector.broadcast %6 : vector<1x128xf32> to vector<64x128xf32>
    %8 = arith.addf %5, %7 : vector<64x128xf32>
    %9 = tpu.iota {dimensions = array<i32: 0>} : vector<64x1xi32>
    %c32_i32 = arith.constant 32 : i32
    %c0_i32 = arith.constant 0 : i32
    %10 = arith.cmpi eq, %c32_i32, %c0_i32 : i32
    %c1_i32 = arith.constant 1 : i32
    %11 = arith.select %10, %c1_i32, %c32_i32 : i32
    %12 = vector.broadcast %11 : i32 to vector<64x1xi32>
    %13 = arith.remsi %9, %12 : vector<64x1xi32>
    %c0_i32_8 = arith.constant 0 : i32
    %14 = vector.broadcast %c0_i32_8 : i32 to vector<64x1xi32>
    %15 = arith.cmpi ne, %13, %14 : vector<64x1xi32>
    %c0_i32_9 = arith.constant 0 : i32
    %16 = vector.broadcast %c0_i32_9 : i32 to vector<64x1xi32>
    %17 = arith.cmpi slt, %13, %16 : vector<64x1xi32>
    %c0_i32_10 = arith.constant 0 : i32
    %18 = arith.cmpi slt, %11, %c0_i32_10 : i32
    %19 = vector.broadcast %18 : i1 to vector<64x1xi1>
    %20 = vector.broadcast %19 : vector<64x1xi1> to vector<64x1xi1>
    %21 = arith.xori %17, %20 : vector<64x1xi1>
    %22 = arith.andi %21, %15 : vector<64x1xi1>
    %23 = vector.broadcast %11 : i32 to vector<64x1xi32>
    %24 = arith.addi %13, %23 : vector<64x1xi32>
    %25 = arith.select %22, %24, %13 : vector<64x1xi1>, vector<64x1xi32>
    %c0_i32_11 = arith.constant 0 : i32
    %26 = vector.broadcast %c0_i32_11 : i32 to vector<64x1xi32>
    %27 = arith.cmpi ne, %25, %26 : vector<64x1xi32>
    %c31_i32 = arith.constant 31 : i32
    %28 = vector.broadcast %c31_i32 : i32 to vector<64x1xi32>
    %29 = arith.cmpi ne, %25, %28 : vector<64x1xi32>
    %30 = arith.truncf %8 : vector<64x128xf32> to vector<64x128xbf16>
    %c1_i32_12 = arith.constant 1 : i32
    %31 = tpu.dynamic_rotate %8 by %c1_i32_12 dim 0 : vector<64x128xf32>, i32 -> vector<64x128xf32>
    %cst_13 = arith.constant 0.000000e+00 : f32
    %32 = vector.shape_cast %27 : vector<64x1xi1> to vector<64x1xi1>
    %33 = vector.broadcast %32 : vector<64x1xi1> to vector<64x128xi1>
    %34 = vector.broadcast %cst_13 : f32 to vector<64x128xf32>
    %35 = arith.select %33, %31, %34 : vector<64x128xi1>, vector<64x128xf32>
    %36 = arith.truncf %35 : vector<64x128xf32> to vector<64x128xbf16>
    %c63_i32 = arith.constant 63 : i32
    %37 = tpu.dynamic_rotate %8 by %c63_i32 dim 0 : vector<64x128xf32>, i32 -> vector<64x128xf32>
    %cst_14 = arith.constant 0.000000e+00 : f32
    %38 = vector.shape_cast %29 : vector<64x1xi1> to vector<64x1xi1>
    %39 = vector.broadcast %38 : vector<64x1xi1> to vector<64x128xi1>
    %40 = vector.broadcast %cst_14 : f32 to vector<64x128xf32>
    %41 = arith.select %39, %37, %40 : vector<64x128xi1>, vector<64x128xf32>
    %42 = arith.truncf %41 : vector<64x128xf32> to vector<64x128xbf16>
    %c0_15 = arith.constant 0 : index
    %c0_16 = arith.constant 0 : index
    %43 = vector.load %arg4[%c0_15, %c0_16] : memref<128x128xbf16, #tpu.memory_space<vmem>>, vector<128x128xbf16>
    %cst_17 = arith.constant dense<0.000000e+00> : vector<64x128xf32>
    %44 = tpu.matmul %36, %43, %cst_17 {dimension_numbers = #tpu.dot_dimension_numbers<[1], [0], [0], [1], [0, 0, 1, 1], [], []>} : vector<64x128xbf16>, vector<128x128xbf16>, vector<64x128xf32> -> vector<64x128xf32>
    %c0_18 = arith.constant 0 : index
    %c0_19 = arith.constant 0 : index
    %45 = vector.load %arg5[%c0_18, %c0_19] : memref<128x128xbf16, #tpu.memory_space<vmem>>, vector<128x128xbf16>
    %cst_20 = arith.constant dense<0.000000e+00> : vector<64x128xf32>
    %46 = tpu.matmul %30, %45, %cst_20 {dimension_numbers = #tpu.dot_dimension_numbers<[1], [0], [0], [1], [0, 0, 1, 1], [], []>} : vector<64x128xbf16>, vector<128x128xbf16>, vector<64x128xf32> -> vector<64x128xf32>
    %47 = arith.addf %44, %46 : vector<64x128xf32>
    %c0_21 = arith.constant 0 : index
    %c0_22 = arith.constant 0 : index
    %48 = vector.load %arg6[%c0_21, %c0_22] : memref<128x128xbf16, #tpu.memory_space<vmem>>, vector<128x128xbf16>
    %cst_23 = arith.constant dense<0.000000e+00> : vector<64x128xf32>
    %49 = tpu.matmul %42, %48, %cst_23 {dimension_numbers = #tpu.dot_dimension_numbers<[1], [0], [0], [1], [0, 0, 1, 1], [], []>} : vector<64x128xbf16>, vector<128x128xbf16>, vector<64x128xf32> -> vector<64x128xf32>
    %50 = arith.addf %47, %49 : vector<64x128xf32>
    %c0_24 = arith.constant 0 : index
    %c0_25 = arith.constant 0 : index
    %51 = vector.load %arg7[%c0_24, %c0_25] : memref<1x128xf32, #tpu.memory_space<vmem>>, vector<1x128xf32>
    %52 = vector.broadcast %51 : vector<1x128xf32> to vector<64x128xf32>
    %53 = arith.addf %50, %52 : vector<64x128xf32>
    %cst_26 = arith.constant 0.000000e+00 : f32
    %54 = vector.broadcast %cst_26 : f32 to vector<64x128xf32>
    %55 = arith.maximumf %53, %54 : vector<64x128xf32>
    %56 = arith.truncf %55 : vector<64x128xf32> to vector<64x128xbf16>
    %c1_i32_27 = arith.constant 1 : i32
    %57 = tpu.dynamic_rotate %55 by %c1_i32_27 dim 0 : vector<64x128xf32>, i32 -> vector<64x128xf32>
    %cst_28 = arith.constant 0.000000e+00 : f32
    %58 = vector.shape_cast %27 : vector<64x1xi1> to vector<64x1xi1>
    %59 = vector.broadcast %58 : vector<64x1xi1> to vector<64x128xi1>
    %60 = vector.broadcast %cst_28 : f32 to vector<64x128xf32>
    %61 = arith.select %59, %57, %60 : vector<64x128xi1>, vector<64x128xf32>
    %62 = arith.truncf %61 : vector<64x128xf32> to vector<64x128xbf16>
    %c63_i32_29 = arith.constant 63 : i32
    %63 = tpu.dynamic_rotate %55 by %c63_i32_29 dim 0 : vector<64x128xf32>, i32 -> vector<64x128xf32>
    %cst_30 = arith.constant 0.000000e+00 : f32
    %64 = vector.shape_cast %29 : vector<64x1xi1> to vector<64x1xi1>
    %65 = vector.broadcast %64 : vector<64x1xi1> to vector<64x128xi1>
    %66 = vector.broadcast %cst_30 : f32 to vector<64x128xf32>
    %67 = arith.select %65, %63, %66 : vector<64x128xi1>, vector<64x128xf32>
    %68 = arith.truncf %67 : vector<64x128xf32> to vector<64x128xbf16>
    %c0_31 = arith.constant 0 : index
    %c0_32 = arith.constant 0 : index
    %69 = vector.load %arg8[%c0_31, %c0_32] : memref<128x128xbf16, #tpu.memory_space<vmem>>, vector<128x128xbf16>
    %cst_33 = arith.constant dense<0.000000e+00> : vector<64x128xf32>
    %70 = tpu.matmul %62, %69, %cst_33 {dimension_numbers = #tpu.dot_dimension_numbers<[1], [0], [0], [1], [0, 0, 1, 1], [], []>} : vector<64x128xbf16>, vector<128x128xbf16>, vector<64x128xf32> -> vector<64x128xf32>
    %c0_34 = arith.constant 0 : index
    %c0_35 = arith.constant 0 : index
    %71 = vector.load %arg9[%c0_34, %c0_35] : memref<128x128xbf16, #tpu.memory_space<vmem>>, vector<128x128xbf16>
    %cst_36 = arith.constant dense<0.000000e+00> : vector<64x128xf32>
    %72 = tpu.matmul %56, %71, %cst_36 {dimension_numbers = #tpu.dot_dimension_numbers<[1], [0], [0], [1], [0, 0, 1, 1], [], []>} : vector<64x128xbf16>, vector<128x128xbf16>, vector<64x128xf32> -> vector<64x128xf32>
    %73 = arith.addf %70, %72 : vector<64x128xf32>
    %c0_37 = arith.constant 0 : index
    %c0_38 = arith.constant 0 : index
    %74 = vector.load %arg10[%c0_37, %c0_38] : memref<128x128xbf16, #tpu.memory_space<vmem>>, vector<128x128xbf16>
    %cst_39 = arith.constant dense<0.000000e+00> : vector<64x128xf32>
    %75 = tpu.matmul %68, %74, %cst_39 {dimension_numbers = #tpu.dot_dimension_numbers<[1], [0], [0], [1], [0, 0, 1, 1], [], []>} : vector<64x128xbf16>, vector<128x128xbf16>, vector<64x128xf32> -> vector<64x128xf32>
    %76 = arith.addf %73, %75 : vector<64x128xf32>
    %c0_40 = arith.constant 0 : index
    %c0_41 = arith.constant 0 : index
    %77 = vector.load %arg11[%c0_40, %c0_41] : memref<1x128xf32, #tpu.memory_space<vmem>>, vector<1x128xf32>
    %78 = vector.broadcast %77 : vector<1x128xf32> to vector<64x128xf32>
    %79 = arith.addf %76, %78 : vector<64x128xf32>
    %cst_42 = arith.constant 0.000000e+00 : f32
    %80 = vector.broadcast %cst_42 : f32 to vector<64x128xf32>
    %81 = arith.maximumf %79, %80 : vector<64x128xf32>
    %c0_43 = arith.constant 0 : index
    %c0_44 = arith.constant 0 : index
    %82 = vector.load %arg12[%c0_43, %c0_44] : memref<64x128xf32, #tpu.memory_space<vmem>>, vector<64x128xf32>
    tpu.vector_store %arg12[%c0_43, %c0_44], %81 {strides = array<i32>} : memref<64x128xf32, #tpu.memory_space<vmem>>, vector<64x128xf32>,
    return
  }
}

module attributes {stable_mosaic.version = 11 : i64} {
  func.func @kernel(%arg0: memref<16x64xf32, #tpu.memory_space<vmem>>, %arg1: memref<32x16xbf16, #tpu.memory_space<vmem>>, %arg2: memref<64x128xbf16, #tpu.memory_space<vmem>>, %arg3: memref<1x128xf32, #tpu.memory_space<vmem>>, %arg4: memref<128x128xbf16, #tpu.memory_space<vmem>>, %arg5: memref<128x128xbf16, #tpu.memory_space<vmem>>, %arg6: memref<128x128xbf16, #tpu.memory_space<vmem>>, %arg7: memref<1x128xf32, #tpu.memory_space<vmem>>, %arg8: memref<32x128xbf16, #tpu.memory_space<vmem>>) attributes {dimension_semantics = [], scalar_prefetch = 0 : i64, scratch_operands = 0 : i64, tpu.core_type = #tpu.core_type<tc>} {
    %c0 = arith.constant 0 : index
    %c0_0 = arith.constant 0 : index
    %0 = vector.load %arg0[%c0, %c0_0] : memref<16x64xf32, #tpu.memory_space<vmem>>, vector<16x64xf32>
    %1 = arith.truncf %0 : vector<16x64xf32> to vector<16x64xbf16>
    %c0_1 = arith.constant 0 : index
    %c0_2 = arith.constant 0 : index
    %2 = vector.load %arg1[%c0_1, %c0_2] : memref<32x16xbf16, #tpu.memory_space<vmem>>, vector<32x16xbf16>
    %cst = arith.constant dense<0.000000e+00> : vector<32x64xf32>
    %3 = tpu.matmul %2, %1, %cst {dimension_numbers = #tpu.dot_dimension_numbers<[1], [0], [0], [1], [0, 0, 1, 1], [], []>} : vector<32x16xbf16>, vector<16x64xbf16>, vector<32x64xf32> -> vector<32x64xf32>
    %4 = arith.truncf %3 : vector<32x64xf32> to vector<32x64xbf16>
    %c0_3 = arith.constant 0 : index
    %c0_4 = arith.constant 0 : index
    %5 = vector.load %arg2[%c0_3, %c0_4] : memref<64x128xbf16, #tpu.memory_space<vmem>>, vector<64x128xbf16>
    %cst_5 = arith.constant dense<0.000000e+00> : vector<32x128xf32>
    %6 = tpu.matmul %4, %5, %cst_5 {dimension_numbers = #tpu.dot_dimension_numbers<[1], [0], [0], [1], [0, 0, 1, 1], [], []>} : vector<32x64xbf16>, vector<64x128xbf16>, vector<32x128xf32> -> vector<32x128xf32>
    %c0_6 = arith.constant 0 : index
    %c0_7 = arith.constant 0 : index
    %7 = vector.load %arg3[%c0_6, %c0_7] : memref<1x128xf32, #tpu.memory_space<vmem>>, vector<1x128xf32>
    %8 = vector.broadcast %7 : vector<1x128xf32> to vector<32x128xf32>
    %9 = arith.addf %6, %8 : vector<32x128xf32>
    %10 = tpu.iota {dimensions = array<i32: 0>} : vector<32x1xi32>
    %c16_i32 = arith.constant 16 : i32
    %c0_i32 = arith.constant 0 : i32
    %11 = arith.cmpi eq, %c16_i32, %c0_i32 : i32
    %c1_i32 = arith.constant 1 : i32
    %12 = arith.select %11, %c1_i32, %c16_i32 : i32
    %13 = vector.broadcast %12 : i32 to vector<32x1xi32>
    %14 = arith.remsi %10, %13 : vector<32x1xi32>
    %c0_i32_8 = arith.constant 0 : i32
    %15 = vector.broadcast %c0_i32_8 : i32 to vector<32x1xi32>
    %16 = arith.cmpi ne, %14, %15 : vector<32x1xi32>
    %c0_i32_9 = arith.constant 0 : i32
    %17 = vector.broadcast %c0_i32_9 : i32 to vector<32x1xi32>
    %18 = arith.cmpi slt, %14, %17 : vector<32x1xi32>
    %c0_i32_10 = arith.constant 0 : i32
    %19 = arith.cmpi slt, %12, %c0_i32_10 : i32
    %20 = vector.broadcast %19 : i1 to vector<32x1xi1>
    %21 = vector.broadcast %20 : vector<32x1xi1> to vector<32x1xi1>
    %22 = arith.xori %18, %21 : vector<32x1xi1>
    %23 = arith.andi %22, %16 : vector<32x1xi1>
    %24 = vector.broadcast %12 : i32 to vector<32x1xi32>
    %25 = arith.addi %14, %24 : vector<32x1xi32>
    %26 = arith.select %23, %25, %14 : vector<32x1xi1>, vector<32x1xi32>
    %c0_i32_11 = arith.constant 0 : i32
    %27 = vector.broadcast %c0_i32_11 : i32 to vector<32x1xi32>
    %28 = arith.cmpi ne, %26, %27 : vector<32x1xi32>
    %c15_i32 = arith.constant 15 : i32
    %29 = vector.broadcast %c15_i32 : i32 to vector<32x1xi32>
    %30 = arith.cmpi ne, %26, %29 : vector<32x1xi32>
    %31 = arith.truncf %9 : vector<32x128xf32> to vector<32x128xbf16>
    %c1_i32_12 = arith.constant 1 : i32
    %32 = tpu.dynamic_rotate %9 by %c1_i32_12 dim 0 : vector<32x128xf32>, i32 -> vector<32x128xf32>
    %cst_13 = arith.constant 0.000000e+00 : f32
    %33 = vector.shape_cast %28 : vector<32x1xi1> to vector<32x1xi1>
    %34 = vector.broadcast %33 : vector<32x1xi1> to vector<32x128xi1>
    %35 = vector.broadcast %cst_13 : f32 to vector<32x128xf32>
    %36 = arith.select %34, %32, %35 : vector<32x128xi1>, vector<32x128xf32>
    %37 = arith.truncf %36 : vector<32x128xf32> to vector<32x128xbf16>
    %c31_i32 = arith.constant 31 : i32
    %38 = tpu.dynamic_rotate %9 by %c31_i32 dim 0 : vector<32x128xf32>, i32 -> vector<32x128xf32>
    %cst_14 = arith.constant 0.000000e+00 : f32
    %39 = vector.shape_cast %30 : vector<32x1xi1> to vector<32x1xi1>
    %40 = vector.broadcast %39 : vector<32x1xi1> to vector<32x128xi1>
    %41 = vector.broadcast %cst_14 : f32 to vector<32x128xf32>
    %42 = arith.select %40, %38, %41 : vector<32x128xi1>, vector<32x128xf32>
    %43 = arith.truncf %42 : vector<32x128xf32> to vector<32x128xbf16>
    %c0_15 = arith.constant 0 : index
    %c0_16 = arith.constant 0 : index
    %44 = vector.load %arg4[%c0_15, %c0_16] : memref<128x128xbf16, #tpu.memory_space<vmem>>, vector<128x128xbf16>
    %cst_17 = arith.constant dense<0.000000e+00> : vector<32x128xf32>
    %45 = tpu.matmul %37, %44, %cst_17 {dimension_numbers = #tpu.dot_dimension_numbers<[1], [0], [0], [1], [0, 0, 1, 1], [], []>} : vector<32x128xbf16>, vector<128x128xbf16>, vector<32x128xf32> -> vector<32x128xf32>
    %c0_18 = arith.constant 0 : index
    %c0_19 = arith.constant 0 : index
    %46 = vector.load %arg5[%c0_18, %c0_19] : memref<128x128xbf16, #tpu.memory_space<vmem>>, vector<128x128xbf16>
    %cst_20 = arith.constant dense<0.000000e+00> : vector<32x128xf32>
    %47 = tpu.matmul %31, %46, %cst_20 {dimension_numbers = #tpu.dot_dimension_numbers<[1], [0], [0], [1], [0, 0, 1, 1], [], []>} : vector<32x128xbf16>, vector<128x128xbf16>, vector<32x128xf32> -> vector<32x128xf32>
    %48 = arith.addf %45, %47 : vector<32x128xf32>
    %c0_21 = arith.constant 0 : index
    %c0_22 = arith.constant 0 : index
    %49 = vector.load %arg6[%c0_21, %c0_22] : memref<128x128xbf16, #tpu.memory_space<vmem>>, vector<128x128xbf16>
    %cst_23 = arith.constant dense<0.000000e+00> : vector<32x128xf32>
    %50 = tpu.matmul %43, %49, %cst_23 {dimension_numbers = #tpu.dot_dimension_numbers<[1], [0], [0], [1], [0, 0, 1, 1], [], []>} : vector<32x128xbf16>, vector<128x128xbf16>, vector<32x128xf32> -> vector<32x128xf32>
    %51 = arith.addf %48, %50 : vector<32x128xf32>
    %c0_24 = arith.constant 0 : index
    %c0_25 = arith.constant 0 : index
    %52 = vector.load %arg7[%c0_24, %c0_25] : memref<1x128xf32, #tpu.memory_space<vmem>>, vector<1x128xf32>
    %53 = vector.broadcast %52 : vector<1x128xf32> to vector<32x128xf32>
    %54 = arith.addf %51, %53 : vector<32x128xf32>
    %cst_26 = arith.constant 0.000000e+00 : f32
    %55 = vector.broadcast %cst_26 : f32 to vector<32x128xf32>
    %56 = arith.maximumf %54, %55 : vector<32x128xf32>
    %57 = arith.truncf %56 : vector<32x128xf32> to vector<32x128xbf16>
    %c0_27 = arith.constant 0 : index
    %c0_28 = arith.constant 0 : index
    %58 = vector.load %arg8[%c0_27, %c0_28] : memref<32x128xbf16, #tpu.memory_space<vmem>>, vector<32x128xbf16>
    tpu.vector_store %arg8[%c0_27, %c0_28], %57 {strides = array<i32>} : memref<32x128xbf16, #tpu.memory_space<vmem>>, vector<32x128xbf16>,
    return
  }
}

</mosaic_0001>

<bundles_post_ra>
// kernel: _decoder_forward_impl.3
= control target key start
LH: loop header
LB: loop body
LE: loop exit
PB: predicated region body
PF: predicated region fallthrough
CT: control target
= control target key end

     0   :  { %vm86_vm0 = vcmask 261120   ;;  %v304_v41 = vlaneseq  ;;  %vm1885_vm4 = vmmov 1   ;;  %s2358_s0 = inlined_call_operand.vmem [shape: bf16[32,128], index: 0, kind: input, shape index: {}]   ;;  %s2359_s1 = inlined_call_operand.vmem [shape: bf16[64,32], index: 1, kind: input, shape index: {}]   ;;  %s2360_s2 = inlined_call_operand.vmem [shape: bf16[128,128], index: 2, kind: input, shape index: {}]   ;;  %s2361_s5 = inlined_call_operand.vmem [shape: bf16[128,128], index: 5, kind: input, shape index: {}]   ;;  %s2362_s4 = inlined_call_operand.vmem [shape: bf16[128,128], index: 4, kind: input, shape index: {}]   ;;  %s2363_s6 = inlined_call_operand.vmem [shape: bf16[128,128], index: 6, kind: input, shape index: {}]   ;;  %s2364_s9 = inlined_call_operand.vmem [shape: bf16[128,128], index: 9, kind: input, shape index: {}]   ;;  %s2365_s3 = inlined_call_operand.vmem [shape: f32[1,128], index: 3, kind: input, shape index: {}]   ;;  %s2366_s8 = inlined_call_operand.vmem [shape: bf16[128,128], index: 8, kind: input, shape index: {}]   ;;  %s2367_s10 = inlined_call_operand.vmem [shape: bf16[128,128], index: 10, kind: input, shape index: {}]   ;;  %s2368_s7 = inlined_call_operand.vmem [shape: f32[1,128], index: 7, kind: input, shape index: {}]   ;;  %s2369_s11 = inlined_call_operand.vmem [shape: f32[1,128], index: 11, kind: input, shape index: {}]   ;;  %s2370_s12 = inlined_call_operand.vmem [shape: f32[64,128], index: 12, kind: output, shape index: {}]  }
   0x1   :  { %v1823_v0 = vld [vmem:[%s2358_s0] sm:$0xff]   ;;  %v1824_v1 = vld [vmem:[%s2358_s0 + $0x8] sm:$0xff]   ;;  %v1827_v4 = vld [vmem:[%s2359_s1 + $0x10] sm:$0xff]  }
   0x2   :  { %1610 = vmatprep.subr.bf16.mxu0 %v1823_v0  ;;  %v1825_v2 = vld [vmem:[%s2359_s1] sm:$0xff]   ;;  %v1826_v3 = vld [vmem:[%s2359_s1 + $0x8] sm:$0xff]   ;;  %v1831_v7 = vld [vmem:[%s2360_s2 + $0x10] sm:$0xff]   ;;  %v2045_v43 = vshrl.u32 %v304_v41, 7 }
   0x3   :  { %1611 = vmatpush3.bf16.msra.mxu0 %v1823_v0  ;;  %1614 = vmatprep.mubr.msk.bf16.mxu0 %vm86_vm0, %v1825_v2  ;;  %v1829_v5 = vld [vmem:[%s2360_s2] sm:$0xff]   ;;  %v1830_v6 = vld [vmem:[%s2360_s2 + $0x8] sm:$0xff]   ;;  %v1828_v8 = vld [vmem:[%s2359_s1 + $0x18] sm:$0xff]  }
   0x4   :  { %1612 = vmatprep.subr.bf16.mxu0 %v1824_v1  ;;  %1622 = vmatprep.subr.bf16.mxu1 %v1829_v5  ;;  %v1832_v9 = vld [vmem:[%s2360_s2 + $0x18] sm:$0xff]   ;;  %v1833_v10 = vld [vmem:[%s2360_s2 + $0x20] sm:$0xff]   ;;  %v1834_v11 = vld [vmem:[%s2360_s2 + $0x28] sm:$0xff]   ;;  %vm437_vm1 = vcmp.lt.s32.totalorder %v2045_v43, 1  ;;  %vm482_vm2 = vcmp.lt.s32.totalorder %v2045_v43, 7 }
   0x5   :  { %1623 = vmatpush3.bf16.msra.mxu1 %v1829_v5  ;;  %v1835_v12 = vld [vmem:[%s2360_s2 + $0x30] sm:$0xff]   ;;  %v1836_v13 = vld [vmem:[%s2360_s2 + $0x38] sm:$0xff]   ;;  %v1837_v14 = vld [vmem:[%s2361_s5] sm:$0xff]  }
   0x6   :  { %1624 = vmatprep.subr.bf16.mxu1 %v1830_v6  ;;  %v1838_v15 = vld [vmem:[%s2361_s5 + $0x8] sm:$0xff]   ;;  %v1839_v16 = vld [vmem:[%s2361_s5 + $0x10] sm:$0xff]   ;;  %v1840_v17 = vld [vmem:[%s2361_s5 + $0x18] sm:$0xff]  }
   0x7   :  { %1613 = vmatpush3.bf16.msra.mxu0 %v1824_v1  ;;  %v1841_v18 = vld [vmem:[%s2361_s5 + $0x20] sm:$0xff]   ;;  %v1842_v19 = vld [vmem:[%s2361_s5 + $0x28] sm:$0xff]   ;;  %v1843_v32 = vld [vmem:[%s2361_s5 + $0x30] sm:$0xff]   ;;  %v317_v1 = vand.u32 31, %v2045_v43 }
   0x8   :  { %1646 = vmatprep.subr.bf16.mxu0 %v1837_v14  ;;  %v1844_v33 = vld [vmem:[%s2361_s5 + $0x38] sm:$0xff]   ;;  %v1845_v34 = vld [vmem:[%s2362_s4] sm:$0xff]   ;;  %v1862_v36 = vld [vmem:[%s2364_s9 + $0x8] sm:$0xff]  }
   0x9   :  { %1625 = vmatpush3.bf16.msra.mxu1 %v1830_v6  ;;  %v1861_v35 = vld [vmem:[%s2364_s9] sm:$0xff]   ;;  %v1863_v37 = vld [vmem:[%s2364_s9 + $0x10] sm:$0xff]   ;;  %v1864_v38 = vld [vmem:[%s2364_s9 + $0x18] sm:$0xff]   ;;  %vm2087_vm3 = vcmp.ne.s32.totalorder %v317_v1, 0  ;;  %v312_v1 = vadd.s32 56, %v2045_v43 }
   0xa   :  { %1615 = vmatmul.mubr.msk.bf16.vlgmr.msra.gmra.mrb[0].mxu0 %vm86_vm0, %v1826_v3  ;;  %1626 = vmatprep.subr.bf16.mxu1 %v1831_v7  ;;  %v1865_v39 = vld [vmem:[%s2364_s9 + $0x20] sm:$0xff]   ;;  %v1866_v40 = vld [vmem:[%s2364_s9 + $0x28] sm:$0xff]   ;;  %vm2102_vm5 = vmpackc.low %vm1885_vm4, %vm2087_vm3 }
   0xb   :  { %1618 = vmatprep.mubr.msk.bf16.mxu0 %vm86_vm0, %v1827_v4  ;;  %1647 = vmatpush3.bf16.msra.mxu0 %v1837_v14  ;;  %v1437_v42 = vld [vmem:[%s2365_s3] ss:$0 sm:$0xff]  ;;  %v1846_v0 = vld [vmem:[%s2362_s4 + $0x8] sm:$0xff]  }
   0xc   :  { %1648 = vmatprep.subr.bf16.mxu0 %v1838_v15 }
   0xd   :  { %1627 = vmatpush3.bf16.msra.mxu1 %v1831_v7 }
   0xe   :  { %1628 = vmatprep.subr.bf16.mxu1 %v1832_v9 }
   0xf   :  { %1649 = vmatpush3.bf16.msra.mxu0 %v1838_v15 }
  0x10   :  { %1650 = vmatprep.subr.bf16.mxu0 %v1839_v16 }
  0x11   :  { %1629 = vmatpush3.bf16.msra.mxu1 %v1832_v9 }
  0x12   :  { %1619 = vmatmul.mubr.msk.bf16.gmra.mrb[4].mxu0 %vm86_vm0, %v1828_v8  ;;  %1630 = vmatprep.subr.bf16.mxu1 %v1833_v10 }
  0x13   :  { %1651 = vmatpush3.bf16.msra.mxu0 %v1839_v16  ;;  %v1847_v16 = vld [vmem:[%s2362_s4 + $0x10] sm:$0xff]  }
  0x14   :  { %1652 = vmatprep.subr.bf16.mxu0 %v1840_v17 }
  0x15   :  { %1631 = vmatpush3.bf16.msra.mxu1 %v1833_v10 }
  0x16   :  { %1632 = vmatprep.subr.bf16.mxu1 %v1834_v11 }
  0x17   :  { %1653 = vmatpush3.bf16.msra.mxu0 %v1840_v17 }
  0x18   :  { %1654 = vmatprep.subr.bf16.mxu0 %v1841_v18 }
  0x19   :  { %1633 = vmatpush3.bf16.msra.mxu1 %v1834_v11 }
  0x1a   :  { %1634 = vmatprep.subr.bf16.mxu1 %v1835_v12 }
  0x1b   :  { %1655 = vmatpush3.bf16.msra.mxu0 %v1841_v18 }
  0x1c   :  { %1656 = vmatprep.subr.bf16.mxu0 %v1842_v19 }
  0x1d   :  { %1635 = vmatpush3.bf16.msra.mxu1 %v1835_v12 }
  0x1e   :  { %1636 = vmatprep.subr.bf16.mxu1 %v1836_v13 }
  0x1f   :  { %1657 = vmatpush3.bf16.msra.mxu0 %v1842_v19 }
  0x20   :  { %1658 = vmatprep.subr.bf16.mxu0 %v1843_v32 }
  0x21   :  { %1637 = vmatpush3.bf16.msra.mxu1 %v1836_v13 }
  0x22   :  { %1718 = vmatprep.subr.bf16.mxu1 %v1861_v35 }
  0x23   :  { %1659 = vmatpush3.bf16.msra.mxu0 %v1843_v32  ;;  %v1848_v32 = vld [vmem:[%s2362_s4 + $0x18] sm:$0xff]  }
  0x24   :  { %1660 = vmatprep.subr.bf16.mxu0 %v1844_v33 }
  0x27   :  { %1661 = vmatpush3.bf16.msra.mxu0 %v1844_v33 }
  0x28   :  { %1670 = vmatprep.subr.bf16.mxu0 %v1845_v34 }
  0xdd   :  { %v1616_v20 = vpop.f32.mrb[0].mxu0 }
  0xde   :  { %v133_v21 = vpop.f32.mrb[1].mxu0 }
  0xdf   :  { %v1617_v22 = vpop.f32.mrb[2].mxu0 }
  0xe0   :  { %v165_v23 = vpack.c.bf16 %v1617_v22, %v1616_v20  ;;  %v136_v24 = vpop.f32.mrb[3].mxu0 }
  0xe1   :  { %v164_v25 = vpack.c.bf16 %v136_v24, %v133_v21 }
  0xe3   :  { %1638 = vmatprep.mubr.bf16.mxu1 %v164_v25 }
  0xe4   :  { %1639 = vmatmul.mubr.bf16.vlgmr.msra.gmra.mrb[0].mxu1 %v165_v23 }
  0xe5   :  { %v1620_v26 = vpop.f32.mrb[4].mxu0  ;;  %1719 = vmatpush3.bf16.msra.mxu1 %v1861_v35 }
  0xe6   :  { %v149_v27 = vpop.f32.mrb[5].mxu0  ;;  %1720 = vmatprep.subr.bf16.mxu1 %v1862_v36 }
  0xe7   :  { %v1621_v28 = vpop.f32.mrb[6].mxu0 }
  0xe8   :  { %v167_v29 = vpack.c.bf16 %v1621_v28, %v1620_v26  ;;  %v152_v30 = vpop.f32.mrb[7].mxu0 }
  0xe9   :  { %v166_v31 = vpack.c.bf16 %v152_v30, %v149_v27  ;;  %1721 = vmatpush3.bf16.msra.mxu1 %v1862_v36 }
  0xea   :  { %1722 = vmatprep.subr.bf16.mxu1 %v1863_v37 }
  0xeb   :  { %1642 = vmatprep.mubr.bf16.mxu1 %v166_v31  ;;  %v1875_v31 = vld [vmem:[%s2366_s8 + $0x30] sm:$0xff]  }
  0xec   :  { %1643 = vmatmul.mubr.bf16.gmra.mrb[4].mxu1 %v167_v29 }
  0xed   :  { %1723 = vmatpush3.bf16.msra.mxu1 %v1863_v37 }
  0xee   :  { %1724 = vmatprep.subr.bf16.mxu1 %v1864_v38 }
  0xf1   :  { %1725 = vmatpush3.bf16.msra.mxu1 %v1864_v38 }
  0xf2   :  { %1726 = vmatprep.subr.bf16.mxu1 %v1865_v39 }
  0xf5   :  { %1727 = vmatpush3.bf16.msra.mxu1 %v1865_v39 }
  0xf6   :  { %1728 = vmatprep.subr.bf16.mxu1 %v1866_v40 }
  0xf9   :  { %1729 = vmatpush3.bf16.msra.mxu1 %v1866_v40 }
 0x1b7   :  { %v1640_v44 = vpop.f32.mrb[0].mxu1 }
 0x1b8   :  { %v282_v45 = vadd.f32 %v1640_v44, %v1437_v42  ;;  %v273_v46 = vpop.f32.mrb[1].mxu1 }
 0x1b9   :  { %v2047_v47 = vadd.f32 %v1437_v42, %v273_v46  ;;  %v1641_v48 = vpop.f32.mrb[2].mxu1  ;;  %v1849_v46 = vld [vmem:[%s2362_s4 + $0x20] sm:$0xff]  }
 0x1ba   :  { %v285_v49 = vadd.f32 %v1641_v48, %v1437_v42  ;;  %v276_v50 = vpop.f32.mrb[3].mxu1  ;;  %v431_v51 = vrot.slane %v282_v45, 7  ;;  %v476_v52 = vrot.slane %v282_v45, 1  ;;  %v1850_v48 = vld [vmem:[%s2362_s4 + $0x28] sm:$0xff]  }
 0x1bb   :  { %v277_v53 = vadd.f32 %v1437_v42, %v276_v50  ;;  %v429_v54 = vrot.slane %v2047_v47, 7  ;;  %v474_v58 = vrot.slane %v2047_v47, 1  ;;  %v309_v50 = vadd.s32 32, %v2045_v43 }
 0x1bc   :  { %v426_v55 = vpack.c.bf16 %v285_v49, %v282_v45  ;;  %v432_v56 = vrot.slane %v285_v49, 7  ;;  %v477_v57 = vrot.slane %v285_v49, 1  ;;  %v1851_v49 = vld [vmem:[%s2362_s4 + $0x30] sm:$0xff]  }
 0x1bd   :  { %v430_v59 = vrot.slane %v277_v53, 7  ;;  %v475_v60 = vrot.slane %v277_v53, 1  ;;  %v425_v61 = vpack.c.bf16 %v277_v53, %v2047_v47  ;;  %v1853_v53 = vld [vmem:[%s2363_s6] sm:$0xff]  }
 0x1be   :  { %v2056_v62 = vsel %vm437_vm1, %v431_v51, %v432_v56  ;;  %v2060_v63 = vsel %vm482_vm2, %v476_v52, %v477_v57 }
 0x1bf   :  { %v2068_v2 = vsel %vm437_vm1, %v430_v59, %v431_v51  ;;  %v1644_v3 = vpop.f32.mrb[4].mxu1  ;;  %1662 = vmatprep.mubr.bf16.mxu0 %v425_v61  ;;  %v444_v4 = vsel %vm437_vm1, %v429_v54, %v430_v59  ;;  %v2074_v5 = vsel %vm482_vm2, %v475_v60, %v476_v52  ;;  %v2078_v6 = vsel %vm482_vm2, %v474_v58, %v475_v60  ;;  %v1852_v51 = vld [vmem:[%s2362_s4 + $0x38] sm:$0xff]   ;;  %v1858_v59 = vld [vmem:[%s2363_s6 + $0x28] sm:$0xff]   ;;  %v1859_v60 = vld [vmem:[%s2363_s6 + $0x30] sm:$0xff]  }
 0x1c0   :  { %v471_v7 = vpack.c.bf16 %v2056_v62, %v2068_v2  ;;  %v298_v8 = vadd.f32 %v1644_v3, %v1437_v42  ;;  %v289_v9 = vpop.f32.mrb[5].mxu1  ;;  %1663 = vmatmul.mubr.bf16.vlgmr.msra.gmra.mrb[8].mxu0 %v426_v55  ;;  %v515_v10 = vpack.c.bf16 %v2074_v5, %v2078_v6  ;;  %v345_v52 = vand.u32 31, %v309_v50  ;;  %v1854_v55 = vld [vmem:[%s2363_s6 + $0x8] sm:$0xff]   ;;  %v1860_v62 = vld [vmem:[%s2363_s6 + $0x38] sm:$0xff]   ;;  %v1867_v5 = vld [vmem:[%s2364_s9 + $0x30] sm:$0xff]  }
 0x1c1   :  { %v290_v11 = vadd.f32 %v1437_v42, %v289_v9  ;;  %1671 = vmatpush3.bf16.msra.mxu0 %v1845_v34  ;;  %v1645_v12 = vpop.f32.mrb[6].mxu1  ;;  %v308_v61 = vadd.s32 24, %v2045_v43  ;;  %v366_v3 = vand.u32 31, %v312_v1  ;;  %1730 = vmatprep.subr.bf16.mxu1 %v1867_v5  ;;  %v1869_v6 = vld [vmem:[%s2366_s8] sm:$0xff]   ;;  %v1876_v43 = vld [vmem:[%s2366_s8 + $0x38] sm:$0xff]  }
 0x1c2   :  { %v435_v13 = vrot.slane %v298_v8, 7  ;;  %v301_v14 = vadd.f32 %v1645_v12, %v1437_v42  ;;  %v292_v15 = vpop.f32.mrb[7].mxu1  ;;  %1672 = vmatprep.subr.bf16.mxu0 %v1846_v0  ;;  %v480_v21 = vrot.slane %v298_v8, 1  ;;  %vm413_vm6 = vcmp.ne.s32.totalorder %v345_v52, 0  ;;  %1731 = vmatpush3.bf16.msra.mxu1 %v1867_v5  ;;  %v1871_v52 = vld [vmem:[%s2366_s8 + $0x10] sm:$0xff]  }
 0x1c3   :  { %v433_v18 = vrot.slane %v290_v11, 7  ;;  %v478_v19 = vrot.slane %v290_v11, 1  ;;  %v293_v20 = vadd.f32 %v1437_v42, %v292_v15  ;;  %vm2150_vm7 = vmpackc.low %vm1885_vm4, %vm413_vm6  ;;  %vm424_vm10 = vcmp.ne.s32.totalorder %v366_v3, 31 }
 0x1c4   :  { %v436_v22 = vrot.slane %v301_v14, 7  ;;  %v481_v23 = vrot.slane %v301_v14, 1  ;;  %v428_v24 = vpack.c.bf16 %v301_v14, %v298_v8  ;;  %vm2196_vm11 = vmpackc.low %vm424_vm10, %vm1885_vm4 }
 0x1c5   :  { %v2093_v25 = vsel %vm482_vm2, %v477_v57, %v478_v19  ;;  %v434_v26 = vrot.slane %v293_v20, 7  ;;  %v479_v27 = vrot.slane %v293_v20, 1  ;;  %1673 = vmatpush3.bf16.msra.mxu0 %v1846_v0  ;;  %v427_v28 = vpack.c.bf16 %v293_v20, %v290_v11  ;;  %v1856_v57 = vld [vmem:[%s2363_s6 + $0x18] sm:$0xff]  }
 0x1c6   :  { %v1477_v29 = vpack.c.bf16 %v2093_v25, %v2060_v63  ;;  %1674 = vmatprep.subr.bf16.mxu0 %v1847_v16  ;;  %v445_v30 = vsel %vm437_vm1, %v436_v22, %v429_v54  ;;  %v441_v33 = vsel %vm437_vm1, %v432_v56, %v433_v18  ;;  %v438_v34 = vsel %vm437_vm1, %v435_v13, %v436_v22  ;;  %v1855_v56 = vld [vmem:[%s2363_s6 + $0x10] sm:$0xff]   ;;  %v1868_v63 = vld [vmem:[%s2364_s9 + $0x38] sm:$0xff]   ;;  %v1881_v54 = vld [vmem:[%s2367_s10 + $0x20] sm:$0xff]  }
 0x1c7   :  { %1666 = vmatprep.mubr.bf16.mxu0 %v427_v28  ;;  %v1463_v35 = vpack.c.bf16 %v444_v4, %v445_v30  ;;  %v440_v36 = vsel %vm437_vm1, %v433_v18, %v434_v26  ;;  %v439_v37 = vsel %vm437_vm1, %v434_v26, %v435_v13  ;;  %v2119_v38 = vsel %vm482_vm2, %v479_v27, %v480_v21 }
 0x1c8   :  { %1667 = vmatmul.mubr.bf16.gmra.mrb[12].mxu0 %v428_v24  ;;  %v1466_v39 = vpack.c.bf16 %v440_v36, %v441_v33  ;;  %v473_v40 = vpack.c.bf16 %v438_v34, %v439_v37  ;;  %v485_v41 = vsel %vm482_vm2, %v478_v19, %v479_v27  ;;  %v2125_v42 = vsel %vm482_vm2, %v480_v21, %v481_v23  ;;  %v1870_v36 = vld [vmem:[%s2366_s8 + $0x8] sm:$0xff]  }
 0x1c9   :  { %1675 = vmatpush3.bf16.msra.mxu0 %v1847_v16  ;;  %1686 = vmatprep.mubr.msk.bf16.mxu0 %vm2102_vm5, %v1463_v35  ;;  %v517_v44 = vpack.c.bf16 %v2119_v38, %v485_v41  ;;  %v490_v45 = vsel %vm482_vm2, %v481_v23, %v474_v58  ;;  %v1857_v58 = vld [vmem:[%s2363_s6 + $0x20] sm:$0xff]   ;;  %v338_v0 = vand.u32 31, %v308_v61 }
 0x1ca   :  { %1676 = vmatprep.subr.bf16.mxu0 %v1848_v32  ;;  %v1480_v47 = vpack.c.bf16 %v490_v45, %v2125_v42  ;;  %1732 = vmatprep.subr.bf16.mxu1 %v1868_v63 }
 0x1cb   :  { %vm420_vm8 = vcmp.ne.s32.totalorder %v338_v0, 31  ;;  %1733 = vmatpush3.bf16.msra.mxu1 %v1868_v63 }
 0x1cc   :  { %vm2186_vm9 = vmpackc.low %vm420_vm8, %vm1885_vm4  ;;  %1742 = vmatprep.subr.bf16.mxu1 %v1869_v6 }
 0x1cd   :  { %1677 = vmatpush3.bf16.msra.mxu0 %v1848_v32 }
 0x1ce   :  { %1678 = vmatprep.subr.bf16.mxu0 %v1849_v46 }
 0x1d1   :  { %1679 = vmatpush3.bf16.msra.mxu0 %v1849_v46 }
 0x1d2   :  { %1680 = vmatprep.subr.bf16.mxu0 %v1850_v48 }
 0x1d5   :  { %1681 = vmatpush3.bf16.msra.mxu0 %v1850_v48 }
 0x1d6   :  { %1682 = vmatprep.subr.bf16.mxu0 %v1851_v49 }
 0x1d9   :  { %1683 = vmatpush3.bf16.msra.mxu0 %v1851_v49 }
 0x1da   :  { %1684 = vmatprep.subr.bf16.mxu0 %v1852_v51 }
 0x1dd   :  { %1685 = vmatpush3.bf16.msra.mxu0 %v1852_v51 }
 0x1de   :  { %1694 = vmatprep.subr.bf16.mxu0 %v1853_v53 }
 0x1e0   :  { %1687 = vmatmul.mubr.bf16.vlgmr.msra.gmra.mrb[8].mxu0 %v471_v7  ;;  %v1482_v7 = vld [vmem:[%s2368_s7] ss:$0 sm:$0xff] }
 0x1e1   :  { %1690 = vmatprep.mubr.msk.bf16.mxu0 %vm2150_vm7, %v1466_v39  ;;  %1695 = vmatpush3.bf16.msra.mxu0 %v1853_v53 }
 0x1e2   :  { %1696 = vmatprep.subr.bf16.mxu0 %v1854_v55 }
 0x1e5   :  { %1697 = vmatpush3.bf16.msra.mxu0 %v1854_v55 }
 0x1e6   :  { %1698 = vmatprep.subr.bf16.mxu0 %v1855_v56 }
 0x1e8   :  { %1691 = vmatmul.mubr.bf16.gmra.mrb[12].mxu0 %v473_v40 }
 0x1e9   :  { %1699 = vmatpush3.bf16.msra.mxu0 %v1855_v56  ;;  %1710 = vmatprep.mubr.bf16.mxu0 %v515_v10 }
 0x1ea   :  { %1700 = vmatprep.subr.bf16.mxu0 %v1856_v57 }
 0x1ed   :  { %1701 = vmatpush3.bf16.msra.mxu0 %v1856_v57 }
 0x1ee   :  { %1702 = vmatprep.subr.bf16.mxu0 %v1857_v58 }
 0x1f1   :  { %1703 = vmatpush3.bf16.msra.mxu0 %v1857_v58 }
 0x1f2   :  { %1704 = vmatprep.subr.bf16.mxu0 %v1858_v59 }
 0x1f5   :  { %1705 = vmatpush3.bf16.msra.mxu0 %v1858_v59 }
 0x1f6   :  { %1706 = vmatprep.subr.bf16.mxu0 %v1859_v60 }
 0x1f9   :  { %1707 = vmatpush3.bf16.msra.mxu0 %v1859_v60 }
 0x1fa   :  { %1708 = vmatprep.subr.bf16.mxu0 %v1860_v62 }
 0x1fd   :  { %1709 = vmatpush3.bf16.msra.mxu0 %v1860_v62 }
 0x200   :  { %1711 = vmatmul.mubr.msk.bf16.vlgmr.msra.gmra.mrb[8].mxu0 %vm2186_vm9, %v1477_v29 }
 0x201   :  { %1714 = vmatprep.mubr.bf16.mxu0 %v517_v44 }
 0x208   :  { %1715 = vmatmul.mubr.msk.bf16.gmra.mrb[12].mxu0 %vm2196_vm11, %v1480_v47 }
 0x2d3   :  { %v1712_v8 = vpop.f32.mrb[8].mxu0 }
 0x2d4   :  { %v923_v9 = vadd.f32 %v1712_v8, %v1482_v7  ;;  %v875_v10 = vpop.f32.mrb[9].mxu0 }
 0x2d5   :  { %v921_v11 = vadd.f32 %v1482_v7, %v875_v10  ;;  %v1713_v12 = vpop.f32.mrb[10].mxu0 }
 0x2d6   :  { %v931_v13 = vmax.f32 %v923_v9, 0.0  ;;  %v924_v14 = vadd.f32 %v1713_v12, %v1482_v7  ;;  %v878_v15 = vpop.f32.mrb[11].mxu0 }
 0x2d7   :  { %v2214_v16 = vmax.f32 %v921_v11, 0.0  ;;  %v922_v17 = vadd.f32 %v1482_v7, %v878_v15 }
 0x2d8   :  { %v932_v18 = vmax.f32 %v924_v14, 0.0  ;;  %v943_v19 = vrot.slane %v931_v13, 7  ;;  %v971_v21 = vrot.slane %v931_v13, 1 }
 0x2d9   :  { %v930_v20 = vmax.f32 %v922_v17, 0.0  ;;  %v941_v25 = vrot.slane %v2214_v16, 7  ;;  %v969_v30 = vrot.slane %v2214_v16, 1 }
 0x2da   :  { %v938_v22 = vpack.c.bf16 %v932_v18, %v931_v13  ;;  %v944_v23 = vrot.slane %v932_v18, 7  ;;  %v972_v24 = vrot.slane %v932_v18, 1 }
 0x2db   :  { %v942_v26 = vrot.slane %v930_v20, 7  ;;  %v970_v27 = vrot.slane %v930_v20, 1  ;;  %v1716_v28 = vpop.f32.mrb[12].mxu0  ;;  %v937_v29 = vpack.c.bf16 %v930_v20, %v2214_v16 }
 0x2dc   :  { %v2221_v32 = vsel %vm437_vm1, %v943_v19, %v944_v23  ;;  %v2225_v33 = vsel %vm482_vm2, %v971_v21, %v972_v24  ;;  %v927_v34 = vadd.f32 %v1716_v28, %v1482_v7  ;;  %v891_v35 = vpop.f32.mrb[13].mxu0  ;;  %v1884_v28 = vld [vmem:[%s2367_s10 + $0x38] sm:$0xff]  }
 0x2dd   :  { %v2232_v37 = vsel %vm437_vm1, %v942_v26, %v943_v19  ;;  %v925_v38 = vadd.f32 %v1482_v7, %v891_v35  ;;  %v1717_v39 = vpop.f32.mrb[14].mxu0  ;;  %1734 = vmatprep.mubr.bf16.mxu1 %v937_v29  ;;  %v955_v40 = vsel %vm437_vm1, %v941_v25, %v942_v26  ;;  %v2238_v41 = vsel %vm482_vm2, %v970_v27, %v971_v21  ;;  %v1873_v19 = vld [vmem:[%s2366_s8 + $0x20] sm:$0xff]   ;;  %v1874_v21 = vld [vmem:[%s2366_s8 + $0x28] sm:$0xff]  }
 0x2de   :  { %v966_v42 = vpack.c.bf16 %v2221_v32, %v2232_v37  ;;  %v935_v44 = vmax.f32 %v927_v34, 0.0  ;;  %v928_v45 = vadd.f32 %v1717_v39, %v1482_v7  ;;  %v894_v46 = vpop.f32.mrb[15].mxu0  ;;  %1735 = vmatmul.mubr.bf16.vlgmr.msra.gmra.mrb[8].mxu1 %v938_v22  ;;  %v2244_v47 = vsel %vm482_vm2, %v969_v30, %v970_v27  ;;  %v1877_v22 = vld [vmem:[%s2367_s10] sm:$0xff]   ;;  %v1882_v26 = vld [vmem:[%s2367_s10 + $0x28] sm:$0xff]   ;;  %v1883_v27 = vld [vmem:[%s2367_s10 + $0x30] sm:$0xff]  }
 0x2df   :  { %v933_v48 = vmax.f32 %v925_v38, 0.0  ;;  %v926_v49 = vadd.f32 %v1482_v7, %v894_v46  ;;  %1743 = vmatpush3.bf16.msra.mxu1 %v1869_v6  ;;  %v993_v50 = vpack.c.bf16 %v2238_v41, %v2244_v47  ;;  %v1872_v6 = vld [vmem:[%s2366_s8 + $0x18] sm:$0xff]   ;;  %v1519_v29 = vld [vmem:[%s2369_s11] ss:$0 sm:$0xff] }
 0x2e0   :  { %v936_v51 = vmax.f32 %v928_v45, 0.0  ;;  %1744 = vmatprep.subr.bf16.mxu1 %v1870_v36  ;;  %v947_v53 = vrot.slane %v935_v44, 7  ;;  %v975_v58 = vrot.slane %v935_v44, 1 }
 0x2e1   :  { %v945_v55 = vrot.slane %v933_v48, 7  ;;  %v973_v56 = vrot.slane %v933_v48, 1  ;;  %v934_v57 = vmax.f32 %v926_v49, 0.0 }
 0x2e2   :  { %v948_v59 = vrot.slane %v936_v51, 7  ;;  %v976_v60 = vrot.slane %v936_v51, 1  ;;  %v940_v61 = vpack.c.bf16 %v936_v51, %v935_v44 }
 0x2e3   :  { %v2253_v62 = vsel %vm482_vm2, %v972_v24, %v973_v56  ;;  %v946_v0 = vrot.slane %v934_v57, 7  ;;  %v974_v1 = vrot.slane %v934_v57, 1  ;;  %1745 = vmatpush3.bf16.msra.mxu1 %v1870_v36  ;;  %v939_v3 = vpack.c.bf16 %v934_v57, %v933_v48  ;;  %v1879_v24 = vld [vmem:[%s2367_s10 + $0x10] sm:$0xff]  }
 0x2e4   :  { %v1514_v5 = vpack.c.bf16 %v2253_v62, %v2225_v33  ;;  %1746 = vmatprep.subr.bf16.mxu1 %v1871_v52  ;;  %v956_v63 = vsel %vm437_vm1, %v948_v59, %v941_v25  ;;  %v952_v7 = vsel %vm437_vm1, %v944_v23, %v945_v55  ;;  %v949_v8 = vsel %vm437_vm1, %v947_v53, %v948_v59  ;;  %v1878_v23 = vld [vmem:[%s2367_s10 + $0x8] sm:$0xff]   ;;  %v1880_v25 = vld [vmem:[%s2367_s10 + $0x18] sm:$0xff]  }
 0x2e5   :  { %1738 = vmatprep.mubr.bf16.mxu1 %v939_v3  ;;  %v1500_v9 = vpack.c.bf16 %v955_v40, %v956_v63  ;;  %v951_v10 = vsel %vm437_vm1, %v945_v55, %v946_v0  ;;  %v950_v11 = vsel %vm437_vm1, %v946_v0, %v947_v53  ;;  %v978_v12 = vsel %vm482_vm2, %v974_v1, %v975_v58 }
 0x2e6   :  { %1739 = vmatmul.mubr.bf16.gmra.mrb[12].mxu1 %v940_v61  ;;  %v1503_v13 = vpack.c.bf16 %v951_v10, %v952_v7  ;;  %v968_v14 = vpack.c.bf16 %v949_v8, %v950_v11  ;;  %v979_v15 = vsel %vm482_vm2, %v973_v56, %v974_v1  ;;  %v977_v16 = vsel %vm482_vm2, %v975_v58, %v976_v60 }
 0x2e7   :  { %1747 = vmatpush3.bf16.msra.mxu1 %v1871_v52  ;;  %1758 = vmatprep.mubr.msk.bf16.mxu1 %vm2102_vm5, %v1500_v9  ;;  %v995_v17 = vpack.c.bf16 %v978_v12, %v979_v15  ;;  %v984_v18 = vsel %vm482_vm2, %v976_v60, %v969_v30 }
 0x2e8   :  { %1748 = vmatprep.subr.bf16.mxu1 %v1872_v6  ;;  %v1517_v20 = vpack.c.bf16 %v984_v18, %v977_v16 }
 0x2eb   :  { %1749 = vmatpush3.bf16.msra.mxu1 %v1872_v6 }
 0x2ec   :  { %1750 = vmatprep.subr.bf16.mxu1 %v1873_v19 }
 0x2ef   :  { %1751 = vmatpush3.bf16.msra.mxu1 %v1873_v19 }
 0x2f0   :  { %1752 = vmatprep.subr.bf16.mxu1 %v1874_v21 }
 0x2f3   :  { %1753 = vmatpush3.bf16.msra.mxu1 %v1874_v21 }
 0x2f4   :  { %1754 = vmatprep.subr.bf16.mxu1 %v1875_v31 }
 0x2f7   :  { %1755 = vmatpush3.bf16.msra.mxu1 %v1875_v31 }
 0x2f8   :  { %1756 = vmatprep.subr.bf16.mxu1 %v1876_v43 }
 0x2fb   :  { %1757 = vmatpush3.bf16.msra.mxu1 %v1876_v43 }
 0x2fc   :  { %1766 = vmatprep.subr.bf16.mxu1 %v1877_v22 }
 0x2fe   :  { %1759 = vmatmul.mubr.bf16.vlgmr.msra.gmra.mrb[8].mxu1 %v966_v42 }
 0x2ff   :  { %1762 = vmatprep.mubr.msk.bf16.mxu1 %vm2150_vm7, %v1503_v13  ;;  %1767 = vmatpush3.bf16.msra.mxu1 %v1877_v22 }
 0x300   :  { %1768 = vmatprep.subr.bf16.mxu1 %v1878_v23 }
 0x303   :  { %1769 = vmatpush3.bf16.msra.mxu1 %v1878_v23 }
 0x304   :  { %1770 = vmatprep.subr.bf16.mxu1 %v1879_v24 }
 0x306   :  { %1763 = vmatmul.mubr.bf16.gmra.mrb[12].mxu1 %v968_v14 }
 0x307   :  { %1771 = vmatpush3.bf16.msra.mxu1 %v1879_v24  ;;  %1782 = vmatprep.mubr.bf16.mxu1 %v993_v50 }
 0x308   :  { %1772 = vmatprep.subr.bf16.mxu1 %v1880_v25 }
 0x30b   :  { %1773 = vmatpush3.bf16.msra.mxu1 %v1880_v25 }
 0x30c   :  { %1774 = vmatprep.subr.bf16.mxu1 %v1881_v54 }
 0x30f   :  { %1775 = vmatpush3.bf16.msra.mxu1 %v1881_v54 }
 0x310   :  { %1776 = vmatprep.subr.bf16.mxu1 %v1882_v26 }
 0x313   :  { %1777 = vmatpush3.bf16.msra.mxu1 %v1882_v26 }
 0x314   :  { %1778 = vmatprep.subr.bf16.mxu1 %v1883_v27 }
 0x317   :  { %1779 = vmatpush3.bf16.msra.mxu1 %v1883_v27 }
 0x318   :  { %1780 = vmatprep.subr.bf16.mxu1 %v1884_v28 }
 0x31b   :  { %1781 = vmatpush3.bf16.msra.mxu1 %v1884_v28 }
 0x31e   :  { %1783 = vmatmul.mubr.msk.bf16.vlgmr.msra.gmra.mrb[8].mxu1 %vm2186_vm9, %v1514_v5 }
 0x31f   :  { %1786 = vmatprep.mubr.bf16.mxu1 %v995_v17 }
 0x326   :  { %1787 = vmatmul.mubr.msk.bf16.gmra.mrb[12].mxu1 %vm2196_vm11, %v1517_v20 }
 0x3f1   :  { %v1784_v30 = vpop.f32.mrb[8].mxu1 }
 0x3f2   :  { %v1401_v32 = vadd.f32 %v1784_v30, %v1519_v29  ;;  %v1353_v34 = vpop.f32.mrb[9].mxu1 }
 0x3f3   :  { %v1399_v35 = vadd.f32 %v1519_v29, %v1353_v34  ;;  %v1785_v36 = vpop.f32.mrb[10].mxu1 }
 0x3f4   :  { %v1409_v37 = vmax.f32 %v1401_v32, 0.0  ;;  %v1402_v38 = vadd.f32 %v1785_v36, %v1519_v29  ;;  %v1356_v39 = vpop.f32.mrb[11].mxu1 }
 0x3f5   :  { %v1407_v33 = vmax.f32 %v1399_v35, 0.0  ;;  %v1400_v40 = vadd.f32 %v1519_v29, %v1356_v39 }
 0x3f6   :  { %1417 = vst [vmem:[%s2370_s12 + $0x10] sm:$0xff] %v1409_v37  ;;  %v1410_v2 = vmax.f32 %v1402_v38, 0.0 }
 0x3f7   :  { %1415 = vst [vmem:[%s2370_s12] sm:$0xff] %v1407_v33  ;;  %v1408_v4 = vmax.f32 %v1400_v40, 0.0 }
 0x3f8   :  { %1418 = vst [vmem:[%s2370_s12 + $0x18] sm:$0xff] %v1410_v2 }
 0x3f9   :  { %1416 = vst [vmem:[%s2370_s12 + $0x8] sm:$0xff] %v1408_v4  ;;  %v1788_v41 = vpop.f32.mrb[12].mxu1 }
 0x3fa   :  { %v1405_v42 = vadd.f32 %v1788_v41, %v1519_v29  ;;  %v1369_v44 = vpop.f32.mrb[13].mxu1 }
 0x3fb   :  { %v1403_v45 = vadd.f32 %v1519_v29, %v1369_v44  ;;  %v1789_v46 = vpop.f32.mrb[14].mxu1 }
 0x3fc   :  { %v1413_v47 = vmax.f32 %v1405_v42, 0.0  ;;  %v1406_v48 = vadd.f32 %v1789_v46, %v1519_v29  ;;  %v1372_v49 = vpop.f32.mrb[15].mxu1 }
 0x3fd   :  { %v1411_v50 = vmax.f32 %v1403_v45, 0.0  ;;  %v1404_v51 = vadd.f32 %v1519_v29, %v1372_v49 }
 0x3fe   :  { %1421 = vst [vmem:[%s2370_s12 + $0x30] sm:$0xff] %v1413_v47  ;;  %v1414_v52 = vmax.f32 %v1406_v48, 0.0 }
 0x3ff   :  { %1419 = vst [vmem:[%s2370_s12 + $0x20] sm:$0xff] %v1411_v50  ;;  %v1412_v53 = vmax.f32 %v1404_v51, 0.0 }
 0x400   :  { %1422 = vst [vmem:[%s2370_s12 + $0x38] sm:$0xff] %v1414_v52 }
 0x401   :  { %1420 = vst [vmem:[%s2370_s12 + $0x28] sm:$0xff] %v1412_v53 }

// kernel: _decoder_forward_impl.2
= control target key start
LH: loop header
LB: loop body
LE: loop exit
PB: predicated region body
PF: predicated region fallthrough
CT: control target
= control target key end

     0   :  { %vm47_vm0 = vcmask 130048   ;;  %vm144_vm1 = vcmask 523264   ;;  %v200_v32 = vlaneseq  ;;  %vm914_vm7 = vmmov 1   ;;  %s1114_s0 = inlined_call_operand.vmem [shape: f32[16,64], index: 0, kind: input, shape index: {}]   ;;  %s1115_s1 = inlined_call_operand.vmem [shape: bf16[32,16], index: 1, kind: input, shape index: {}]   ;;  %s1116_s2 = inlined_call_operand.vmem [shape: bf16[64,128], index: 2, kind: input, shape index: {}]   ;;  %s1117_s5 = inlined_call_operand.vmem [shape: bf16[128,128], index: 5, kind: input, shape index: {}]   ;;  %s1118_s4 = inlined_call_operand.vmem [shape: bf16[128,128], index: 4, kind: input, shape index: {}]   ;;  %s1119_s6 = inlined_call_operand.vmem [shape: bf16[128,128], index: 6, kind: input, shape index: {}]   ;;  %s1120_s3 = inlined_call_operand.vmem [shape: f32[1,128], index: 3, kind: input, shape index: {}]   ;;  %s1121_s7 = inlined_call_operand.vmem [shape: f32[1,128], index: 7, kind: input, shape index: {}]   ;;  %s1122_s8 = inlined_call_operand.vmem [shape: bf16[32,128], index: 8, kind: output, shape index: {}]  }
   0x1   :  { %v30_v0 = vld [vmem:[%s1114_s0] sm:$0xff]  ;;  %v31_v1 = vld [vmem:[%s1114_s0 + $0x8] sm:$0xff]  ;;  %v888_v7 = vld [vmem:[%s1116_s2 + $0x10] sm:$0xff]  }
   0x2   :  { %v32_v2 = vpack.c.bf16 %v31_v1, %v30_v0  ;;  %v884_v3 = vld [vmem:[%s1115_s1] sm:$0xff]   ;;  %v885_v4 = vld [vmem:[%s1115_s1 + $0x8] sm:$0xff]   ;;  %v889_v8 = vld [vmem:[%s1116_s2 + $0x18] sm:$0xff]   ;;  %v1035_v33 = vshrl.u32 %v200_v32, 7 }
   0x3   :  { %799 = vmatprep.mubr.msk.bf16.mxu1 %vm47_vm0, %v884_v3  ;;  %v886_v5 = vld [vmem:[%s1116_s2] sm:$0xff]   ;;  %v887_v6 = vld [vmem:[%s1116_s2 + $0x8] sm:$0xff]   ;;  %v895_v12 = vld [vmem:[%s1118_s4 + $0x10] sm:$0xff]  }
   0x4   :  { %797 = vmatprep.subr.bf16.mxu1 %v32_v2  ;;  %v890_v9 = vld [vmem:[%s1117_s5] sm:$0xff]   ;;  %v893_v11 = vld [vmem:[%s1118_s4 + $0x8] sm:$0xff]   ;;  %v897_v13 = vld [vmem:[%s1118_s4 + $0x18] sm:$0xff]   ;;  %v203_v34 = vadd.s32 16, %v1035_v33  ;;  %v202_v36 = vadd.s32 8, %v1035_v33  ;;  %v209_v37 = vand.u32 15, %v1035_v33 }
   0x5   :  { %798 = vmatpush3.bf16.msra.mxu1 %v32_v2  ;;  %v891_v10 = vld [vmem:[%s1118_s4] sm:$0xff]   ;;  %v901_v15 = vld [vmem:[%s1118_s4 + $0x28] sm:$0xff]   ;;  %v894_v23 = vld [vmem:[%s1117_s5 + $0x10] sm:$0xff]   ;;  %vm290_vm2 = vcmp.lt.s32.totalorder %v1035_v33, 7  ;;  %vm267_vm3 = vcmp.lt.s32.totalorder %v1035_v33, 1 }
   0x6   :  { %803 = vmatprep.subr.bf16.mxu1 %v886_v5  ;;  %835 = vmatprep.subr.bf16.mxu0 %v891_v10  ;;  %v899_v14 = vld [vmem:[%s1118_s4 + $0x20] sm:$0xff]   ;;  %v892_v22 = vld [vmem:[%s1117_s5 + $0x8] sm:$0xff]   ;;  %v896_v24 = vld [vmem:[%s1117_s5 + $0x18] sm:$0xff]   ;;  %v223_v38 = vand.u32 15, %v203_v34  ;;  %v216_v44 = vand.u32 15, %v202_v36  ;;  %vm1045_vm4 = vcmp.ne.s32.totalorder %v209_v37, 0 }
   0x7   :  { %836 = vmatpush3.bf16.msra.mxu0 %v891_v10  ;;  %v898_v25 = vld [vmem:[%s1117_s5 + $0x20] sm:$0xff]   ;;  %v900_v26 = vld [vmem:[%s1117_s5 + $0x28] sm:$0xff]   ;;  %v902_v27 = vld [vmem:[%s1117_s5 + $0x30] sm:$0xff]  }
   0x8   :  { %800 = vmatmul.mubr.msk.bf16.vlgmr.msra.gmra.mrb[0].mxu1 %vm47_vm0, %v885_v4  ;;  %837 = vmatprep.subr.bf16.mxu0 %v893_v11  ;;  %v903_v28 = vld [vmem:[%s1118_s4 + $0x30] sm:$0xff]   ;;  %v904_v29 = vld [vmem:[%s1117_s5 + $0x38] sm:$0xff]   ;;  %v906_v31 = vld [vmem:[%s1119_s6] sm:$0xff]   ;;  %vm1049_vm5 = vcmp.ne.s32.totalorder %v223_v38, 0  ;;  %vm1053_vm6 = vcmp.ne.s32.totalorder %v216_v44, 15 }
   0x9   :  { %804 = vmatpush3.bf16.msra.mxu1 %v886_v5  ;;  %v905_v30 = vld [vmem:[%s1118_s4 + $0x38] sm:$0xff]   ;;  %v695_v35 = vld [vmem:[%s1120_s3] ss:$0 sm:$0xff]  ;;  %vm718_vm8 = vmpackc.low %vm914_vm7, %vm1045_vm4 }
   0xa   :  { %805 = vmatprep.subr.bf16.mxu1 %v887_v6  ;;  %vm721_vm9 = vmpackc.low %vm914_vm7, %vm1049_vm5  ;;  %v908_v10 = vld [vmem:[%s1119_s6 + $0x10] sm:$0xff]  }
   0xb   :  { %838 = vmatpush3.bf16.msra.mxu0 %v893_v11  ;;  %vm732_vm10 = vmpackc.low %vm1053_vm6, %vm914_vm7  ;;  %v909_v11 = vld [vmem:[%s1119_s6 + $0x18] sm:$0xff]  }
   0xc   :  { %839 = vmatprep.subr.bf16.mxu0 %v895_v12 }
   0xd   :  { %806 = vmatpush3.bf16.msra.mxu1 %v887_v6 }
   0xe   :  { %807 = vmatprep.subr.bf16.mxu1 %v888_v7 }
   0xf   :  { %840 = vmatpush3.bf16.msra.mxu0 %v895_v12  ;;  %v910_v12 = vld [vmem:[%s1119_s6 + $0x20] sm:$0xff]  }
  0x10   :  { %841 = vmatprep.subr.bf16.mxu0 %v897_v13 }
  0x11   :  { %808 = vmatpush3.bf16.msra.mxu1 %v888_v7 }
  0x12   :  { %809 = vmatprep.subr.bf16.mxu1 %v889_v8 }
  0x13   :  { %842 = vmatpush3.bf16.msra.mxu0 %v897_v13  ;;  %v911_v13 = vld [vmem:[%s1119_s6 + $0x28] sm:$0xff]  }
  0x14   :  { %843 = vmatprep.subr.bf16.mxu0 %v899_v14 }
  0x15   :  { %810 = vmatpush3.bf16.msra.mxu1 %v889_v8 }
  0x16   :  { %815 = vmatprep.subr.bf16.mxu1 %v890_v9 }
  0x17   :  { %844 = vmatpush3.bf16.msra.mxu0 %v899_v14  ;;  %v912_v14 = vld [vmem:[%s1119_s6 + $0x30] sm:$0xff]  }
  0x18   :  { %845 = vmatprep.subr.bf16.mxu0 %v901_v15 }
  0x1b   :  { %846 = vmatpush3.bf16.msra.mxu0 %v901_v15  ;;  %v204_v15 = vadd.s32 24, %v1035_v33 }
  0x1c   :  { %847 = vmatprep.subr.bf16.mxu0 %v903_v28 }
  0x1f   :  { %848 = vmatpush3.bf16.msra.mxu0 %v903_v28 }
  0x20   :  { %849 = vmatprep.subr.bf16.mxu0 %v905_v30 }
  0x23   :  { %850 = vmatpush3.bf16.msra.mxu0 %v905_v30 }
  0x24   :  { %855 = vmatprep.subr.bf16.mxu0 %v906_v31 }
  0xdb   :  { %v801_v16 = vpop.f32.mrb[0].mxu1 }
  0xdc   :  { %v88_v17 = vpop.f32.mrb[1].mxu1 }
  0xdd   :  { %v802_v18 = vpop.f32.mrb[2].mxu1 }
  0xde   :  { %v104_v19 = vpack.c.bf16 %v802_v18, %v801_v16  ;;  %v91_v20 = vpop.f32.mrb[3].mxu1  ;;  %v913_v16 = vld [vmem:[%s1119_s6 + $0x38] sm:$0xff]  }
  0xdf   :  { %v103_v21 = vpack.c.bf16 %v91_v20, %v88_v17  ;;  %v230_v17 = vand.u32 15, %v204_v15 }
  0xe1   :  { %811 = vmatprep.mubr.msk.bf16.mxu1 %vm144_vm1, %v103_v21  ;;  %vm260_vm11 = vcmp.ne.s32.totalorder %v230_v17, 15 }
  0xe2   :  { %812 = vmatmul.mubr.msk.bf16.vlgmr.msra.gmra.mrb[4].mxu1 %vm144_vm1, %v104_v19  ;;  %vm735_vm12 = vmpackc.low %vm260_vm11, %vm914_vm7 }
  0xe3   :  { %816 = vmatpush3.bf16.msra.mxu1 %v890_v9  ;;  %v907_v9 = vld [vmem:[%s1119_s6 + $0x8] sm:$0xff]  }
  0xe4   :  { %817 = vmatprep.subr.bf16.mxu1 %v892_v22 }
  0xe7   :  { %818 = vmatpush3.bf16.msra.mxu1 %v892_v22 }
  0xe8   :  { %819 = vmatprep.subr.bf16.mxu1 %v894_v23 }
  0xeb   :  { %820 = vmatpush3.bf16.msra.mxu1 %v894_v23  ;;  %v738_v23 = vld [vmem:[%s1121_s7] ss:$0 sm:$0xff] }
  0xec   :  { %821 = vmatprep.subr.bf16.mxu1 %v896_v24 }
  0xef   :  { %822 = vmatpush3.bf16.msra.mxu1 %v896_v24 }
  0xf0   :  { %823 = vmatprep.subr.bf16.mxu1 %v898_v25 }
  0xf3   :  { %824 = vmatpush3.bf16.msra.mxu1 %v898_v25 }
  0xf4   :  { %825 = vmatprep.subr.bf16.mxu1 %v900_v26 }
  0xf7   :  { %826 = vmatpush3.bf16.msra.mxu1 %v900_v26 }
  0xf8   :  { %827 = vmatprep.subr.bf16.mxu1 %v902_v27 }
  0xfb   :  { %828 = vmatpush3.bf16.msra.mxu1 %v902_v27 }
  0xfc   :  { %829 = vmatprep.subr.bf16.mxu1 %v904_v29 }
  0xff   :  { %830 = vmatpush3.bf16.msra.mxu1 %v904_v29 }
 0x1b5   :  { %v813_v39 = vpop.f32.mrb[4].mxu1 }
 0x1b6   :  { %v194_v40 = vadd.f32 %v813_v39, %v695_v35  ;;  %v185_v41 = vpop.f32.mrb[5].mxu1 }
 0x1b7   :  { %v186_v42 = vadd.f32 %v695_v35, %v185_v41  ;;  %v814_v43 = vpop.f32.mrb[6].mxu1 }
 0x1b8   :  { %v197_v45 = vadd.f32 %v814_v43, %v695_v35  ;;  %v188_v46 = vpop.f32.mrb[7].mxu1  ;;  %v265_v49 = vrot.slane %v194_v40, 7  ;;  %v288_v53 = vrot.slane %v194_v40, 1 }
 0x1b9   :  { %v263_v50 = vrot.slane %v186_v42, 7  ;;  %v286_v51 = vrot.slane %v186_v42, 1  ;;  %v189_v52 = vadd.f32 %v695_v35, %v188_v46 }
 0x1ba   :  { %v262_v54 = vpack.c.bf16 %v197_v45, %v194_v40  ;;  %v266_v55 = vrot.slane %v197_v45, 7  ;;  %v289_v56 = vrot.slane %v197_v45, 1 }
 0x1bb   :  { %v264_v57 = vrot.slane %v189_v52, 7  ;;  %v287_v58 = vrot.slane %v189_v52, 1  ;;  %v261_v59 = vpack.c.bf16 %v189_v52, %v186_v42 }
 0x1bc   :  { %v291_v61 = vsel %vm290_vm2, %v288_v53, %v289_v56  ;;  %v294_v62 = vsel %vm290_vm2, %v289_v56, %v286_v51  ;;  %v271_v63 = vsel %vm267_vm3, %v266_v55, %v263_v50  ;;  %v268_v0 = vsel %vm267_vm3, %v265_v49, %v266_v55 }
 0x1bd   :  { %v736_v1 = vpack.c.bf16 %v294_v62, %v291_v61  ;;  %831 = vmatprep.mubr.bf16.mxu1 %v261_v59  ;;  %v270_v2 = vsel %vm267_vm3, %v263_v50, %v264_v57  ;;  %v269_v3 = vsel %vm267_vm3, %v264_v57, %v265_v49  ;;  %v292_v4 = vsel %vm290_vm2, %v287_v58, %v288_v53 }
 0x1be   :  { %832 = vmatmul.mubr.bf16.vlgmr.msra.gmra.mrb[8].mxu1 %v262_v54  ;;  %v719_v5 = vpack.c.bf16 %v270_v2, %v271_v63  ;;  %v722_v6 = vpack.c.bf16 %v268_v0, %v269_v3  ;;  %v293_v7 = vsel %vm290_vm2, %v286_v51, %v287_v58 }
 0x1bf   :  { %v733_v8 = vpack.c.bf16 %v292_v4, %v293_v7 }
 0x1c0   :  { %851 = vmatprep.mubr.msk.bf16.mxu0 %vm718_vm8, %v719_v5 }
 0x1c1   :  { %852 = vmatmul.mubr.msk.bf16.vlgmr.msra.gmra.mrb[0].mxu0 %vm721_vm9, %v722_v6 }
 0x1c2   :  { %856 = vmatpush3.bf16.msra.mxu0 %v906_v31  ;;  %871 = vmatprep.mubr.msk.bf16.mxu0 %vm732_vm10, %v733_v8 }
 0x1c3   :  { %857 = vmatprep.subr.bf16.mxu0 %v907_v9 }
 0x1c6   :  { %858 = vmatpush3.bf16.msra.mxu0 %v907_v9 }
 0x1c7   :  { %859 = vmatprep.subr.bf16.mxu0 %v908_v10 }
 0x1ca   :  { %860 = vmatpush3.bf16.msra.mxu0 %v908_v10 }
 0x1cb   :  { %861 = vmatprep.subr.bf16.mxu0 %v909_v11 }
 0x1ce   :  { %862 = vmatpush3.bf16.msra.mxu0 %v909_v11 }
 0x1cf   :  { %863 = vmatprep.subr.bf16.mxu0 %v910_v12 }
 0x1d2   :  { %864 = vmatpush3.bf16.msra.mxu0 %v910_v12 }
 0x1d3   :  { %865 = vmatprep.subr.bf16.mxu0 %v911_v13 }
 0x1d6   :  { %866 = vmatpush3.bf16.msra.mxu0 %v911_v13 }
 0x1d7   :  { %867 = vmatprep.subr.bf16.mxu0 %v912_v14 }
 0x1da   :  { %868 = vmatpush3.bf16.msra.mxu0 %v912_v14 }
 0x1db   :  { %869 = vmatprep.subr.bf16.mxu0 %v913_v16 }
 0x1de   :  { %870 = vmatpush3.bf16.msra.mxu0 %v913_v16 }
 0x1e1   :  { %872 = vmatmul.mubr.msk.bf16.vlgmr.msra.gmra.mrb[0].mxu0 %vm735_vm12, %v736_v1 }
 0x291   :  { %v833_v18 = vpop.f32.mrb[8].mxu1 }
 0x292   :  { %v423_v19 = vpop.f32.mrb[9].mxu1 }
 0x293   :  { %v834_v20 = vpop.f32.mrb[10].mxu1 }
 0x294   :  { %v426_v21 = vpop.f32.mrb[11].mxu1 }
 0x2b4   :  { %v873_v22 = vpop.f32.mrb[0].mxu0 }
 0x2b5   :  { %v875_v24 = vadd.f32 %v873_v22, %v833_v18  ;;  %v633_v25 = vpop.f32.mrb[1].mxu0 }
 0x2b6   :  { %v876_v26 = vadd.f32 %v633_v25, %v423_v19  ;;  %v874_v27 = vpop.f32.mrb[2].mxu0 }
 0x2b7   :  { %v661_v28 = vadd.f32 %v875_v24, %v738_v23  ;;  %v877_v29 = vadd.f32 %v874_v27, %v834_v20  ;;  %v636_v30 = vpop.f32.mrb[3].mxu0 }
 0x2b8   :  { %v659_v31 = vadd.f32 %v876_v26, %v738_v23  ;;  %v878_v32 = vadd.f32 %v636_v30, %v426_v21 }
 0x2b9   :  { %v662_v33 = vadd.f32 %v877_v29, %v738_v23  ;;  %v665_v35 = vmax.f32 %v661_v28, 0.0 }
 0x2ba   :  { %v660_v34 = vadd.f32 %v878_v32, %v738_v23  ;;  %v663_v37 = vmax.f32 %v659_v31, 0.0 }
 0x2bb   :  { %v666_v36 = vmax.f32 %v662_v33, 0.0 }
 0x2bc   :  { %v664_v38 = vmax.f32 %v660_v34, 0.0 }
 0x2bd   :  { %v755_v39 = vpack.c.bf16 %v666_v36, %v665_v35 }
 0x2be   :  { %v750_v40 = vpack.c.bf16 %v664_v38, %v663_v37 }
 0x2bf   :  { %757 = vst [vmem:[%s1122_s8 + $0x8] sm:$0xff] %v755_v39  }
 0x2c0   :  { %751 = vst [vmem:[%s1122_s8] sm:$0xff] %v750_v40  }

</bundles_post_ra>
